<compile_context>
chip_gen: v5e
topology: v5e:2x2
jax: 0.10.0
libtpu: 0.0.40
codegen_flags: <defaults>
</compile_context>

<pallas_src>
import jax
import jax.numpy as jnp
from jax.experimental import pallas as pl
from jax.experimental.pallas import tpu as pltpu

EMB_ROWS = 100    # nn.Embedding(100, 5)
EMB_DIM = 5
EMB_BLOCK = 128   # per-feature projected table padded to a sublane-aligned block


def _round_up(x, m):
    return ((x + m - 1) // m) * m


def _fused_kernel(x_num_ref, x_cat_ref, pemb_ref, w1n_ref, b1_ref,
                  w2_ref, b2_ref, w3_ref, b3_ref,
                  w4_ref, b4_ref, w5_ref, b5_ref, w6_ref, b6_ref, out_ref):
    """One batch tile.  Activations are (feature, TB); weights stay VMEM-resident."""
    tb = x_num_ref.shape[1]
    n_cat = x_cat_ref.shape[0]

    # ---- fc_cat fused with the embedding lookups (no activation) -----------
    # emb_j(cat_j) @ W1_j == one_hot(cat_j) @ (emb_table_j @ W1_j).  The n_cat
    # projected tables are concatenated (128-row blocks) -> ONE combined one-hot
    # matmul.  The iota is built once (JAX does not CSE broadcast_in_dim).
    cat = x_cat_ref[...]                                            # (n_cat, tb) i32
    iota = jax.lax.broadcasted_iota(jnp.int32, (EMB_BLOCK, tb), 0)  # hoisted, built once
    oh_blocks = [(cat[j:j + 1, :] == iota).astype(jnp.bfloat16)     # (128, tb) each
                 for j in range(n_cat)]
    onehot = jnp.concatenate(oh_blocks, axis=0)                     # (n_cat*128, tb)

    h = jnp.dot(pemb_ref[...], onehot, preferred_element_type=jnp.float32)
    h = h + jnp.dot(w1n_ref[...], x_num_ref[...],
                    preferred_element_type=jnp.float32)
    h = (h + b1_ref[...]).astype(jnp.bfloat16)                      # (64, tb)

    # ---- encoder: Linear -> ReLU -> Linear -> ReLU --------------------------
    h = jnp.dot(w2_ref[...], h, preferred_element_type=jnp.float32) + b2_ref[...]
    h = jnp.maximum(h, 0.0).astype(jnp.bfloat16)
    enc = jnp.dot(w3_ref[...], h, preferred_element_type=jnp.float32) + b3_ref[...]
    enc = jnp.maximum(enc, 0.0).astype(jnp.bfloat16)

    # ---- classifier: Linear -> ReLU -> Linear -> ReLU -> Linear -------------
    c = jnp.dot(w4_ref[...], enc, preferred_element_type=jnp.float32) + b4_ref[...]
    c = jnp.maximum(c, 0.0).astype(jnp.bfloat16)
    c = jnp.dot(w5_ref[...], c, preferred_element_type=jnp.float32) + b5_ref[...]
    c = jnp.maximum(c, 0.0).astype(jnp.bfloat16)
    out_ref[...] = (jnp.dot(w6_ref[...], c, preferred_element_type=jnp.float32)
                    + b6_ref[...])                                  # (num_classes, tb)


def prepare_params(params):
    """One-time parameter prep (hoisted off the per-call critical path):
    project the embedding tables through their fc_cat slice, pad each to 128
    rows, transpose every weight to (out, in), cast matmul operands to bf16."""
    n_cat = len(params["emb_tables"])
    w1 = params["w1"]                                               # (n_cat*5 + n_num, 64)

    blocks = []
    for j in range(n_cat):
        proj = jnp.dot(params["emb_tables"][j],
                       w1[j * EMB_DIM:(j + 1) * EMB_DIM, :])        # (100, 64)
        proj = jnp.pad(proj, ((0, EMB_BLOCK - EMB_ROWS), (0, 0)))   # (128, 64)
        blocks.append(proj)
    p_emb_t = jnp.concatenate(blocks, axis=0).T.astype(jnp.bfloat16)  # (64, n_cat*128)
    w1n_t = w1[n_cat * EMB_DIM:, :].T.astype(jnp.bfloat16)            # (64, n_num)

    def wt(name):  # (in, out) -> (out, in) bf16
        return params[name].T.astype(jnp.bfloat16)

    def bt(name):  # (1, out) -> (out, 1) f32 column (added to the f32 accumulator)
        return params[name].reshape(-1, 1).astype(jnp.float32)

    return dict(
        n_cat=n_cat,
        p_emb_t=p_emb_t, w1n_t=w1n_t, b1=bt("b1"),
        w2_t=wt("w2"), b2=bt("b2"), w3_t=wt("w3"), b3=bt("b3"),
        w4_t=wt("w4"), b4=bt("b4"), w5_t=wt("w5"), b5=bt("b5"),
        w6_t=wt("w6"), b6=bt("b6"),
    )


def base_model_forward(x_cat, x_num, prepped, *, batch_tile=1024):
    """Reproduces BaseModel.forward (decoder is unused in forward, so omitted)."""
    B = x_num.shape[0]
    n_num = x_num.shape[1]
    n_cat = prepped["n_cat"]
    num_classes = prepped["w6_t"].shape[0]

    # Batch is the lane dimension -> tile must be a multiple of 128.  Guarantee
    # at least two grid steps so the "parallel" axis gives both v7x cores work.
    tb = min(batch_tile, max(128, _round_up(pl.cdiv(B, 2), 128)))
    bp = max(_round_up(B, tb), 2 * tb)

    xn_t = jnp.pad(x_num.astype(jnp.bfloat16).T, ((0, 0), (0, bp - B)))   # (n_num, bp)
    xc_t = jnp.pad(x_cat.astype(jnp.int32).T, ((0, 0), (0, bp - B)))      # (n_cat, bp)

    def act_spec(rows):
        return pl.BlockSpec((rows, tb), lambda i: (0, i))

    def const_spec(a):  # whole array, constant block index -> stays VMEM-resident
        return pl.BlockSpec(a.shape, lambda i: (0, 0))

    weights = (prepped["p_emb_t"], prepped["w1n_t"], prepped["b1"],
               prepped["w2_t"], prepped["b2"], prepped["w3_t"], prepped["b3"],
               prepped["w4_t"], prepped["b4"], prepped["w5_t"], prepped["b5"],
               prepped["w6_t"], prepped["b6"])

    out_t = pl.pallas_call(
        _fused_kernel,
        out_shape=jax.ShapeDtypeStruct((num_classes, bp), jnp.float32),
        grid=(bp // tb,),
        in_specs=[act_spec(n_num), act_spec(n_cat)]
                 + [const_spec(w) for w in weights],
        out_specs=pl.BlockSpec((num_classes, tb), lambda i: (0, i)),
        compiler_params=pltpu.CompilerParams(
            dimension_semantics=("parallel",)),
    )(xn_t, xc_t, *weights)

    return out_t[:, :B].T                                            # (B, num_classes)


def init_params(key, n_cat, n_num, encoding_dim, num_classes):
    """Deterministic synthetic parameters matching the PyTorch shapes
    (nn.Linear weights stored as (in, out))."""
    d_in = n_cat * EMB_DIM + n_num

    def lin(k, fan_in, fan_out):
        kw, kb = jax.random.split(k)
        w = jax.random.normal(kw, (fan_in, fan_out), jnp.float32) * 0.05
        b = jax.random.normal(kb, (1, fan_out), jnp.float32) * 0.05
        return w, b

    keys = jax.random.split(key, 7 + n_cat)
    emb_tables = [jax.random.normal(keys[i], (EMB_ROWS, EMB_DIM), jnp.float32) * 0.05
                  for i in range(n_cat)]
    w1, b1 = lin(keys[n_cat + 0], d_in, 64)
    w2, b2 = lin(keys[n_cat + 1], 64, 64)
    w3, b3 = lin(keys[n_cat + 2], 64, encoding_dim)
    w4, b4 = lin(keys[n_cat + 3], encoding_dim, 32)
    w5, b5 = lin(keys[n_cat + 4], 32, 16)
    w6, b6 = lin(keys[n_cat + 5], 16, num_classes)
    # NOTE: the PyTorch module also defines a `decoder`, but forward() never
    # uses it, so it is intentionally not instantiated here.
    return dict(emb_tables=emb_tables,
                w1=w1, b1=b1, w2=w2, b2=b2, w3=w3, b3=b3,
                w4=w4, b4=b4, w5=w5, b5=b5, w6=w6, b6=b6)


if __name__ == "__main__":
    key = jax.random.PRNGKey(0)

    # Small synthetic problem: 3 categorical features, 4 numeric features.
    B, n_cat, n_num = 8, 3, 4
    encoding_dim, num_classes = 32, 10

    kp, kc, kn = jax.random.split(key, 3)
    params = init_params(kp, n_cat, n_num, encoding_dim, num_classes)
    prepped = prepare_params(params)          # one-time parameter prep

    x_cat = jax.random.randint(kc, (B, n_cat), 0, EMB_ROWS, dtype=jnp.int32)
    x_num = jax.random.normal(kn, (B, n_num), jnp.float32)

    out = base_model_forward(x_cat, x_num, prepped)
    out = jax.block_until_ready(out)

    # sanity check against a pure-JAX f32 reference of the same math
    embs = [jnp.take(t, x_cat[:, i], axis=0) for i, t in enumerate(params["emb_tables"])]
    x = jnp.concatenate(embs + [x_num], axis=1)
    h = x @ params["w1"] + params["b1"]
    h = jnp.maximum(h @ params["w2"] + params["b2"], 0.0)
    enc = jnp.maximum(h @ params["w3"] + params["b3"], 0.0)
    c = jnp.maximum(enc @ params["w4"] + params["b4"], 0.0)
    c = jnp.maximum(c @ params["w5"] + params["b5"], 0.0)
    ref = c @ params["w6"] + params["b6"]

    assert out.shape == (B, num_classes)
    # bf16 MXU operands with f32 accumulation -> looser tolerance than f32.
    assert jnp.allclose(out, ref, atol=2e-2, rtol=2e-2), "mismatch vs reference"

    print("KERNEL_OK")
</pallas_src>

<mosaic_0001>
module attributes {stable_mosaic.version = 11 : i64} {
  func.func @_fused_kernel(%arg0: i32, %arg1: memref<4x128xbf16, #tpu.memory_space<vmem>>, %arg2: memref<3x128xi32, #tpu.memory_space<vmem>>, %arg3: memref<64x384xbf16, #tpu.memory_space<vmem>>, %arg4: memref<64x4xbf16, #tpu.memory_space<vmem>>, %arg5: memref<64x1xf32, #tpu.memory_space<vmem>>, %arg6: memref<64x64xbf16, #tpu.memory_space<vmem>>, %arg7: memref<64x1xf32, #tpu.memory_space<vmem>>, %arg8: memref<32x64xbf16, #tpu.memory_space<vmem>>, %arg9: memref<32x1xf32, #tpu.memory_space<vmem>>, %arg10: memref<32x32xbf16, #tpu.memory_space<vmem>>, %arg11: memref<32x1xf32, #tpu.memory_space<vmem>>, %arg12: memref<16x32xbf16, #tpu.memory_space<vmem>>, %arg13: memref<16x1xf32, #tpu.memory_space<vmem>>, %arg14: memref<10x16xbf16, #tpu.memory_space<vmem>>, %arg15: memref<10x1xf32, #tpu.memory_space<vmem>>, %arg16: memref<10x128xf32, #tpu.memory_space<vmem>>) attributes {dimension_semantics = [#tpu.dimension_semantics<parallel>], iteration_bounds = array<i64: 2>, scalar_prefetch = 0 : i64, scratch_operands = 0 : i64, tpu.core_type = #tpu.core_type<tc>, window_params = [{transform_indices = @transform_0, window_bounds = array<i64: 4, 128>}, {transform_indices = @transform_1, window_bounds = array<i64: 3, 128>}, {pipeline_mode = #tpu.pipeline_mode<synchronous>, transform_indices = @transform_2, window_bounds = array<i64: 64, 384>}, {pipeline_mode = #tpu.pipeline_mode<synchronous>, transform_indices = @transform_3, window_bounds = array<i64: 64, 4>}, {pipeline_mode = #tpu.pipeline_mode<synchronous>, transform_indices = @transform_4, window_bounds = array<i64: 64, 1>}, {pipeline_mode = #tpu.pipeline_mode<synchronous>, transform_indices = @transform_5, window_bounds = array<i64: 64, 64>}, {pipeline_mode = #tpu.pipeline_mode<synchronous>, transform_indices = @transform_6, window_bounds = array<i64: 64, 1>}, {pipeline_mode = #tpu.pipeline_mode<synchronous>, transform_indices = @transform_7, window_bounds = array<i64: 32, 64>}, {pipeline_mode = #tpu.pipeline_mode<synchronous>, transform_indices = @transform_8, window_bounds = array<i64: 32, 1>}, {pipeline_mode = #tpu.pipeline_mode<synchronous>, transform_indices = @transform_9, window_bounds = array<i64: 32, 32>}, {pipeline_mode = #tpu.pipeline_mode<synchronous>, transform_indices = @transform_10, window_bounds = array<i64: 32, 1>}, {pipeline_mode = #tpu.pipeline_mode<synchronous>, transform_indices = @transform_11, window_bounds = array<i64: 16, 32>}, {pipeline_mode = #tpu.pipeline_mode<synchronous>, transform_indices = @transform_12, window_bounds = array<i64: 16, 1>}, {pipeline_mode = #tpu.pipeline_mode<synchronous>, transform_indices = @transform_13, window_bounds = array<i64: 10, 16>}, {pipeline_mode = #tpu.pipeline_mode<synchronous>, transform_indices = @transform_14, window_bounds = array<i64: 10, 1>}, {transform_indices = @transform_15, window_bounds = array<i64: 10, 128>}]} {
    %c0 = arith.constant 0 : index
    %c0_0 = arith.constant 0 : index
    %0 = vector.load %arg2[%c0, %c0_0] : memref<3x128xi32, #tpu.memory_space<vmem>>, vector<3x128xi32>
    %1 = tpu.iota {dimensions = array<i32: 0>} : vector<128x128xi32>
    %2 = vector.extract_strided_slice %0 {offsets = [0, 0], sizes = [1, 128], strides = [1, 1]} : vector<3x128xi32> to vector<1x128xi32>
    %3 = vector.broadcast %2 : vector<1x128xi32> to vector<128x128xi32>
    %4 = arith.cmpi eq, %3, %1 : vector<128x128xi32>
    %5 = arith.extui %4 : vector<128x128xi1> to vector<128x128xi32>
    %6 = arith.sitofp %5 : vector<128x128xi32> to vector<128x128xf32>
    %7 = arith.truncf %6 : vector<128x128xf32> to vector<128x128xbf16>
    %8 = vector.extract_strided_slice %0 {offsets = [1, 0], sizes = [1, 128], strides = [1, 1]} : vector<3x128xi32> to vector<1x128xi32>
    %9 = vector.broadcast %8 : vector<1x128xi32> to vector<128x128xi32>
    %10 = arith.cmpi eq, %9, %1 : vector<128x128xi32>
    %11 = arith.extui %10 : vector<128x128xi1> to vector<128x128xi32>
    %12 = arith.sitofp %11 : vector<128x128xi32> to vector<128x128xf32>
    %13 = arith.truncf %12 : vector<128x128xf32> to vector<128x128xbf16>
    %14 = vector.extract_strided_slice %0 {offsets = [2, 0], sizes = [1, 128], strides = [1, 1]} : vector<3x128xi32> to vector<1x128xi32>
    %15 = vector.broadcast %14 : vector<1x128xi32> to vector<128x128xi32>
    %16 = arith.cmpi eq, %15, %1 : vector<128x128xi32>
    %17 = arith.extui %16 : vector<128x128xi1> to vector<128x128xi32>
    %18 = arith.sitofp %17 : vector<128x128xi32> to vector<128x128xf32>
    %19 = arith.truncf %18 : vector<128x128xf32> to vector<128x128xbf16>
    %20 = tpu.concatenate %7, %13, %19 in 0 : vector<128x128xbf16>, vector<128x128xbf16>, vector<128x128xbf16> -> vector<384x128xbf16>
    %c0_1 = arith.constant 0 : index
    %c0_2 = arith.constant 0 : index
    %21 = vector.load %arg3[%c0_1, %c0_2] : memref<64x384xbf16, #tpu.memory_space<vmem>>, vector<64x384xbf16>
    %cst = arith.constant dense<0.000000e+00> : vector<64x128xf32>
    %22 = tpu.matmul %21, %20, %cst {dimension_numbers = #tpu.dot_dimension_numbers<[1], [0], [0], [1], [0, 0, 1, 1], [], []>} : vector<64x384xbf16>, vector<384x128xbf16>, vector<64x128xf32> -> vector<64x128xf32>
    %c0_3 = arith.constant 0 : index
    %c0_4 = arith.constant 0 : index
    %23 = vector.load %arg4[%c0_3, %c0_4] : memref<64x4xbf16, #tpu.memory_space<vmem>>, vector<64x4xbf16>
    %c0_5 = arith.constant 0 : index
    %c0_6 = arith.constant 0 : index
    %24 = vector.load %arg1[%c0_5, %c0_6] : memref<4x128xbf16, #tpu.memory_space<vmem>>, vector<4x128xbf16>
    %cst_7 = arith.constant dense<0.000000e+00> : vector<64x128xf32>
    %25 = tpu.matmul %23, %24, %cst_7 {dimension_numbers = #tpu.dot_dimension_numbers<[1], [0], [0], [1], [0, 0, 1, 1], [], []>} : vector<64x4xbf16>, vector<4x128xbf16>, vector<64x128xf32> -> vector<64x128xf32>
    %26 = arith.addf %22, %25 : vector<64x128xf32>
    %c0_8 = arith.constant 0 : index
    %c0_9 = arith.constant 0 : index
    %27 = vector.load %arg5[%c0_8, %c0_9] : memref<64x1xf32, #tpu.memory_space<vmem>>, vector<64x1xf32>
    %28 = vector.broadcast %27 : vector<64x1xf32> to vector<64x128xf32>
    %29 = arith.addf %26, %28 : vector<64x128xf32>
    %30 = arith.truncf %29 : vector<64x128xf32> to vector<64x128xbf16>
    %c0_10 = arith.constant 0 : index
    %c0_11 = arith.constant 0 : index
    %31 = vector.load %arg6[%c0_10, %c0_11] : memref<64x64xbf16, #tpu.memory_space<vmem>>, vector<64x64xbf16>
    %cst_12 = arith.constant dense<0.000000e+00> : vector<64x128xf32>
    %32 = tpu.matmul %31, %30, %cst_12 {dimension_numbers = #tpu.dot_dimension_numbers<[1], [0], [0], [1], [0, 0, 1, 1], [], []>} : vector<64x64xbf16>, vector<64x128xbf16>, vector<64x128xf32> -> vector<64x128xf32>
    %c0_13 = arith.constant 0 : index
    %c0_14 = arith.constant 0 : index
    %33 = vector.load %arg7[%c0_13, %c0_14] : memref<64x1xf32, #tpu.memory_space<vmem>>, vector<64x1xf32>
    %34 = vector.broadcast %33 : vector<64x1xf32> to vector<64x128xf32>
    %35 = arith.addf %32, %34 : vector<64x128xf32>
    %cst_15 = arith.constant 0.000000e+00 : f32
    %36 = vector.broadcast %cst_15 : f32 to vector<64x128xf32>
    %37 = arith.maximumf %35, %36 : vector<64x128xf32>
    %38 = arith.truncf %37 : vector<64x128xf32> to vector<64x128xbf16>
    %c0_16 = arith.constant 0 : index
    %c0_17 = arith.constant 0 : index
    %39 = vector.load %arg8[%c0_16, %c0_17] : memref<32x64xbf16, #tpu.memory_space<vmem>>, vector<32x64xbf16>
    %cst_18 = arith.constant dense<0.000000e+00> : vector<32x128xf32>
    %40 = tpu.matmul %39, %38, %cst_18 {dimension_numbers = #tpu.dot_dimension_numbers<[1], [0], [0], [1], [0, 0, 1, 1], [], []>} : vector<32x64xbf16>, vector<64x128xbf16>, vector<32x128xf32> -> vector<32x128xf32>
    %c0_19 = arith.constant 0 : index
    %c0_20 = arith.constant 0 : index
    %41 = vector.load %arg9[%c0_19, %c0_20] : memref<32x1xf32, #tpu.memory_space<vmem>>, vector<32x1xf32>
    %42 = vector.broadcast %41 : vector<32x1xf32> to vector<32x128xf32>
    %43 = arith.addf %40, %42 : vector<32x128xf32>
    %cst_21 = arith.constant 0.000000e+00 : f32
    %44 = vector.broadcast %cst_21 : f32 to vector<32x128xf32>
    %45 = arith.maximumf %43, %44 : vector<32x128xf32>
    %46 = arith.truncf %45 : vector<32x128xf32> to vector<32x128xbf16>
    %c0_22 = arith.constant 0 : index
    %c0_23 = arith.constant 0 : index
    %47 = vector.load %arg10[%c0_22, %c0_23] : memref<32x32xbf16, #tpu.memory_space<vmem>>, vector<32x32xbf16>
    %cst_24 = arith.constant dense<0.000000e+00> : vector<32x128xf32>
    %48 = tpu.matmul %47, %46, %cst_24 {dimension_numbers = #tpu.dot_dimension_numbers<[1], [0], [0], [1], [0, 0, 1, 1], [], []>} : vector<32x32xbf16>, vector<32x128xbf16>, vector<32x128xf32> -> vector<32x128xf32>
    %c0_25 = arith.constant 0 : index
    %c0_26 = arith.constant 0 : index
    %49 = vector.load %arg11[%c0_25, %c0_26] : memref<32x1xf32, #tpu.memory_space<vmem>>, vector<32x1xf32>
    %50 = vector.broadcast %49 : vector<32x1xf32> to vector<32x128xf32>
    %51 = arith.addf %48, %50 : vector<32x128xf32>
    %cst_27 = arith.constant 0.000000e+00 : f32
    %52 = vector.broadcast %cst_27 : f32 to vector<32x128xf32>
    %53 = arith.maximumf %51, %52 : vector<32x128xf32>
    %54 = arith.truncf %53 : vector<32x128xf32> to vector<32x128xbf16>
    %c0_28 = arith.constant 0 : index
    %c0_29 = arith.constant 0 : index
    %55 = vector.load %arg12[%c0_28, %c0_29] : memref<16x32xbf16, #tpu.memory_space<vmem>>, vector<16x32xbf16>
    %cst_30 = arith.constant dense<0.000000e+00> : vector<16x128xf32>
    %56 = tpu.matmul %55, %54, %cst_30 {dimension_numbers = #tpu.dot_dimension_numbers<[1], [0], [0], [1], [0, 0, 1, 1], [], []>} : vector<16x32xbf16>, vector<32x128xbf16>, vector<16x128xf32> -> vector<16x128xf32>
    %c0_31 = arith.constant 0 : index
    %c0_32 = arith.constant 0 : index
    %57 = vector.load %arg13[%c0_31, %c0_32] : memref<16x1xf32, #tpu.memory_space<vmem>>, vector<16x1xf32>
    %58 = vector.broadcast %57 : vector<16x1xf32> to vector<16x128xf32>
    %59 = arith.addf %56, %58 : vector<16x128xf32>
    %cst_33 = arith.constant 0.000000e+00 : f32
    %60 = vector.broadcast %cst_33 : f32 to vector<16x128xf32>
    %61 = arith.maximumf %59, %60 : vector<16x128xf32>
    %62 = arith.truncf %61 : vector<16x128xf32> to vector<16x128xbf16>
    %c0_34 = arith.constant 0 : index
    %c0_35 = arith.constant 0 : index
    %63 = vector.load %arg14[%c0_34, %c0_35] : memref<10x16xbf16, #tpu.memory_space<vmem>>, vector<10x16xbf16>
    %cst_36 = arith.constant dense<0.000000e+00> : vector<10x128xf32>
    %64 = tpu.matmul %63, %62, %cst_36 {dimension_numbers = #tpu.dot_dimension_numbers<[1], [0], [0], [1], [0, 0, 1, 1], [], []>} : vector<10x16xbf16>, vector<16x128xbf16>, vector<10x128xf32> -> vector<10x128xf32>
    %c0_37 = arith.constant 0 : index
    %c0_38 = arith.constant 0 : index
    %65 = vector.load %arg15[%c0_37, %c0_38] : memref<10x1xf32, #tpu.memory_space<vmem>>, vector<10x1xf32>
    %66 = vector.broadcast %65 : vector<10x1xf32> to vector<10x128xf32>
    %67 = arith.addf %64, %66 : vector<10x128xf32>
    %c0_39 = arith.constant 0 : index
    %c0_40 = arith.constant 0 : index
    %68 = vector.load %arg16[%c0_39, %c0_40] : memref<10x128xf32, #tpu.memory_space<vmem>>, vector<10x128xf32>
    tpu.vector_store %arg16[%c0_39, %c0_40], %67 {strides = array<i32>} : memref<10x128xf32, #tpu.memory_space<vmem>>, vector<10x128xf32>,
    return
  }
  func.func @transform_0(%arg0: i32) -> (i32, i32) {
    %c0_i32 = arith.constant 0 : i32
    %c0_i32_0 = arith.constant 0 : i32
    return %c0_i32, %arg0 : i32, i32
  }
  func.func @transform_1(%arg0: i32) -> (i32, i32) {
    %c0_i32 = arith.constant 0 : i32
    %c0_i32_0 = arith.constant 0 : i32
    return %c0_i32, %arg0 : i32, i32
  }
  func.func @transform_2(%arg0: i32) -> (i32, i32) {
    %c0_i32 = arith.constant 0 : i32
    %c0_i32_0 = arith.constant 0 : i32
    %c0_i32_1 = arith.constant 0 : i32
    return %c0_i32, %c0_i32_0 : i32, i32
  }
  func.func @transform_3(%arg0: i32) -> (i32, i32) {
    %c0_i32 = arith.constant 0 : i32
    %c0_i32_0 = arith.constant 0 : i32
    %c0_i32_1 = arith.constant 0 : i32
    return %c0_i32, %c0_i32_0 : i32, i32
  }
  func.func @transform_4(%arg0: i32) -> (i32, i32) {
    %c0_i32 = arith.constant 0 : i32
    %c0_i32_0 = arith.constant 0 : i32
    %c0_i32_1 = arith.constant 0 : i32
    return %c0_i32, %c0_i32_0 : i32, i32
  }
  func.func @transform_5(%arg0: i32) -> (i32, i32) {
    %c0_i32 = arith.constant 0 : i32
    %c0_i32_0 = arith.constant 0 : i32
    %c0_i32_1 = arith.constant 0 : i32
    return %c0_i32, %c0_i32_0 : i32, i32
  }
  func.func @transform_6(%arg0: i32) -> (i32, i32) {
    %c0_i32 = arith.constant 0 : i32
    %c0_i32_0 = arith.constant 0 : i32
    %c0_i32_1 = arith.constant 0 : i32
    return %c0_i32, %c0_i32_0 : i32, i32
  }
  func.func @transform_7(%arg0: i32) -> (i32, i32) {
    %c0_i32 = arith.constant 0 : i32
    %c0_i32_0 = arith.constant 0 : i32
    %c0_i32_1 = arith.constant 0 : i32
    return %c0_i32, %c0_i32_0 : i32, i32
  }
  func.func @transform_8(%arg0: i32) -> (i32, i32) {
    %c0_i32 = arith.constant 0 : i32
    %c0_i32_0 = arith.constant 0 : i32
    %c0_i32_1 = arith.constant 0 : i32
    return %c0_i32, %c0_i32_0 : i32, i32
  }
  func.func @transform_9(%arg0: i32) -> (i32, i32) {
    %c0_i32 = arith.constant 0 : i32
    %c0_i32_0 = arith.constant 0 : i32
    %c0_i32_1 = arith.constant 0 : i32
    return %c0_i32, %c0_i32_0 : i32, i32
  }
  func.func @transform_10(%arg0: i32) -> (i32, i32) {
    %c0_i32 = arith.constant 0 : i32
    %c0_i32_0 = arith.constant 0 : i32
    %c0_i32_1 = arith.constant 0 : i32
    return %c0_i32, %c0_i32_0 : i32, i32
  }
  func.func @transform_11(%arg0: i32) -> (i32, i32) {
    %c0_i32 = arith.constant 0 : i32
    %c0_i32_0 = arith.constant 0 : i32
    %c0_i32_1 = arith.constant 0 : i32
    return %c0_i32, %c0_i32_0 : i32, i32
  }
  func.func @transform_12(%arg0: i32) -> (i32, i32) {
    %c0_i32 = arith.constant 0 : i32
    %c0_i32_0 = arith.constant 0 : i32
    %c0_i32_1 = arith.constant 0 : i32
    return %c0_i32, %c0_i32_0 : i32, i32
  }
  func.func @transform_13(%arg0: i32) -> (i32, i32) {
    %c0_i32 = arith.constant 0 : i32
    %c0_i32_0 = arith.constant 0 : i32
    %c0_i32_1 = arith.constant 0 : i32
    return %c0_i32, %c0_i32_0 : i32, i32
  }
  func.func @transform_14(%arg0: i32) -> (i32, i32) {
    %c0_i32 = arith.constant 0 : i32
    %c0_i32_0 = arith.constant 0 : i32
    %c0_i32_1 = arith.constant 0 : i32
    return %c0_i32, %c0_i32_0 : i32, i32
  }
  func.func @transform_15(%arg0: i32) -> (i32, i32) {
    %c0_i32 = arith.constant 0 : i32
    %c0_i32_0 = arith.constant 0 : i32
    return %c0_i32, %arg0 : i32, i32
  }
}

</mosaic_0001>

<bundles_post_ra>
// kernel: tpu_custom_call.1
= control target key start
LH: loop header
LB: loop body
LE: loop exit
PB: predicated region body
PF: predicated region fallthrough
CT: control target
= control target key end

     0   :  { %s2469_s0 = inlined_call_operand.vmem [shape: bf16[4,256], index: 0, kind: input, shape index: {}]   ;;  %s2470_s1 = inlined_call_operand.vmem [shape: s32[3,256], index: 1, kind: input, shape index: {}]   ;;  %s2471_s2 = inlined_call_operand.vmem [shape: bf16[64,384], index: 2, kind: input, shape index: {}]   ;;  %s2472_s3 = inlined_call_operand.vmem [shape: bf16[64,4], index: 3, kind: input, shape index: {}]   ;;  %s2473_s4 = inlined_call_operand.vmem [shape: f32[64,1], index: 4, kind: input, shape index: {}]   ;;  %s2474_s5 = inlined_call_operand.vmem [shape: bf16[64,64], index: 5, kind: input, shape index: {}]   ;;  %s2475_s6 = inlined_call_operand.vmem [shape: f32[64,1], index: 6, kind: input, shape index: {}]   ;;  %s2476_s7 = inlined_call_operand.vmem [shape: bf16[32,64], index: 7, kind: input, shape index: {}]   ;;  %s2477_s8 = inlined_call_operand.vmem [shape: f32[32,1], index: 8, kind: input, shape index: {}]   ;;  %s2478_s9 = inlined_call_operand.vmem [shape: bf16[32,32], index: 9, kind: input, shape index: {}]   ;;  %s2479_s10 = inlined_call_operand.vmem [shape: f32[32,1], index: 10, kind: input, shape index: {}]   ;;  %s2480_s11 = inlined_call_operand.vmem [shape: bf16[16,32], index: 11, kind: input, shape index: {}]   ;;  %s2481_s12 = inlined_call_operand.vmem [shape: f32[16,1], index: 12, kind: input, shape index: {}]   ;;  %s2482_s13 = inlined_call_operand.vmem [shape: bf16[10,16], index: 13, kind: input, shape index: {}]   ;;  %s2483_s14 = inlined_call_operand.vmem [shape: f32[10,1], index: 14, kind: input, shape index: {}]   ;;  %s2484_s15 = inlined_call_operand.hbm [shape: f32[10,256], index: 15, kind: output, shape index: {}]  }
   0x1   :  { %2489 = sst [smem:[#allocation9_spill]] %s2469_s0 }
   0x2   :  { %2490 = sst [smem:[#allocation10_spill]] %s2470_s1 }
   0x3   :  { %2491 = sst [smem:[#allocation11_spill]] %s2471_s2 }
   0x4   :  { %20 = vsyncpa [#allocation3], 0 }
   0x5   :  { %22 = vsyncpa [#allocation3 + $0x1], 0  ;;  %s2002_s18 = smov 0   ;;  %s2004_s19 = smov 0  }
   0x6   :  { %s2006_s20 = smov 0   ;;  %s2008_s21 = smov 0  }
   0x7 LB: > { %2492 = sst [smem:[#allocation5_spill]] %s1911_s20  ;;  %s2023_s22 = sadd.s32 4294967295, %s1915_s21   ;;  %s1915_s21 = sphi %s2008_s21, %s2502_s21   ;;  %s1911_s20 = sphi %s2006_s20, %s2504_s20   ;;  %s1907_s19 = sphi %s2004_s19, %s2506_s19   ;;  %s1903_s18 = sphi %s2002_s18, %s2505_s18  }
   0x8   : > { %s1603_s23 = sadd.s32 4294967294, %s1915_s21   ;;  %s2027_s24 = sadd.s32 1, %s1915_s21  }
   0x9   : > { %2493 = sst [smem:[#allocation6_spill]] %s2027_s24  ;;  %s360_s25 = sadd.s32 1, %s1911_s20 }
   0xa   : > { %s357_s26 = ssub.s32 %s1915_s21, %s2027_s24  ;;  %p370_p0 = scmp.ne.s32.totalorder %s1911_s20, %s1907_s19 }
   0xb   : > { %p358_p1 = scmp.eq.s32.totalorder %s357_s26, 0  ;;  %p371_p2 = scmp.eq.s32.totalorder %s2023_s22, 1 }
   0xc   : > { %p376_p3 = scmp.ne.s32.totalorder %s1907_s19, %s1903_s18  ;;  %p377_p4 = scmp.eq.s32.totalorder %s1603_s23, 1 }
   0xd   : > { %s2038_s27 = scalar_select %p358_p1, %s1911_s20, %s360_s25  }
   0xe   : > { %p2040_p5 = por %p371_p2, %p370_p0  ;;  %p2044_p6 = por %p377_p4, %p376_p3 }
   0xf   : > { %2494 = sst [smem:[#allocation7_spill]] %s2038_s27  ;;  %p1606_p7 = scmp.ge.s32.totalorder %s1915_s21, 1 }
  0x10   : > { %s2496_s29 = scalar_select %p2044_p6, 1, 0 }
  0x11   : > { %p448_p8 = scmp.lt.s32.totalorder %s1915_s21, 3 }
  0x12   : > { %2497 = sst [smem:[#allocation8_spill]] %s2496_s29 }
  0x13   : > { %p449_p9 = pnand %p1606_p7, %p448_p8 }
  0x14   : > { %p499_p10 = scmp.lt.s32.totalorder (!%p449_p9), %s2023_s22, 1  ;;  %s2498_s1 = sld [smem:[#allocation10_spill]] (!%p449_p9) }
  0x15   : > { %452 = sbr.rel (%p449_p9) target bundleno = 1137 (0x471), region = 80  ;;  %s2499_s0 = sld [smem:[#allocation9_spill]] (!%p449_p9) }
  0x16   : > { %s2500_s2 = sld [smem:[#allocation11_spill]] (!%p449_p9)  ;;  %s496_s29 = sand.u32 (!%p449_p9), 1, %s1907_s19  }
  0x1a   : > { %v509_v0 = vlaneseq  ;;  %s2052_s30 = scalar_select %p499_p10, %s2023_s22, 1  ;;  %v1917_v16 = vmov 0.0  }
  0x1c   : > { %v2054_v1 = vshrl.u32 %v509_v0, 7  ;;  %s1609_s16 = sshll.u32 %s2052_s30, 2  ;;  %s1608_s26 = sshll.u32 %s2052_s30, 1 }
  0x1d   : > { %s506_s25 = scalar_lea.vmem %s2498_s1, %s1609_s16  ;;  %s502_s17 = scalar_lea.vmem %s2499_s0, %s1608_s26 }
  0x1e   : > { %v524_v2 = vadd.s32 112, %v2054_v1  ;;  %v525_v3 = vadd.s32 120, %v2054_v1  ;;  %v508_v4 = vld [vmem:[%s506_s25] sm:$0x7]  ;;  %v522_v5 = vadd.s32 96, %v2054_v1  ;;  %v2064_v6 = vadd.s32 104, %v2054_v1 }
  0x1f   : > { %v2067_v7 = vadd.s32 80, %v2054_v1  ;;  %v2069_v8 = vperm.slane %v508_v4, 0  ;;  %v2071_v9 = vperm.slane %v508_v4, 1  ;;  %v2074_v10 = vadd.s32 88, %v2054_v1  ;;  %s1607_s25 = sshll.u32 %s496_s29, 4  ;;  %s1777_s26 = sshll.u32 %s2023_s22, 3 }
  0x20   : > { %v2077_v11 = vadd.s32 64, %v2054_v1  ;;  %v2079_v12 = vperm.slane %v508_v4, 2  ;;  %v2082_v13 = vadd.s32 72, %v2054_v1  ;;  %v2085_v14 = vadd.s32 48, %v2054_v1  ;;  %s498_s30 = scalar_lea.vmem [#allocation2], %s1607_s25  ;;  %s1525_s20 = scalar_lea.hbm %s2484_s15, %s1777_s26 }
  0x21   : > { %v2088_v15 = vadd.s32 56, %v2054_v1  ;;  %vm541_vm0 = vcmp.eq.s32.totalorder %v2069_v8, %v524_v2  ;;  %vm542_vm1 = vcmp.eq.s32.totalorder %v2069_v8, %v525_v3  ;;  %vm606_vm2 = vcmp.eq.s32.totalorder %v2071_v9, %v524_v2  ;;  %s1526_s27 = sshll.u32 %s498_s30, 4  ;;  %s1528_s16 = sshll.u32 %s1525_s20, 4  ;;  %s1527_s27 = int_to_ptr.vmem [resolvable:$true] %s1526_s27  ;;  %s1529_s16 = int_to_ptr.hbm [resolvable:$true] %s1528_s16 }
  0x22   : > { %vm607_vm3 = vcmp.eq.s32.totalorder %v2071_v9, %v525_v3  ;;  %v1624_v17 = vsel %vm541_vm0, 1.0, %v1917_v16  ;;  %v1625_v18 = vsel %vm542_vm1, 1.0, %v1917_v16  ;;  %v1640_v19 = vsel %vm606_vm2, 1.0, %v1917_v16  ;;  %s1867_s23 = sshra.s32 %s1529_s16, 4  ;;  %s1873_s26 = scalar_lea.hbm %s2484_s15, 32  ;;  %s1868_s23 = int_to_ptr.hbm [resolvable:$true] %s1867_s23 }
  0x23   : > { %v1641_v20 = vsel %vm607_vm3, 1.0, %v1917_v16  ;;  %v589_v21 = vpack.c.bf16 %v1624_v17, %v1624_v17  ;;  %v590_v22 = vpack.c.bf16 %v1625_v18, %v1625_v18  ;;  %v654_v23 = vpack.c.bf16 %v1640_v19, %v1640_v19  ;;  %s1869_s22 = scalar_lea.hbm %s1868_s23, 16  ;;  %p1874_p0 = scmp.lt.s32.totalorder %s1868_s23, %s2484_s15 }
  0x24   : > { %v655_v24 = vpack.c.bf16 %v1641_v20, %v1641_v20  ;;  %vm671_vm4 = vcmp.eq.s32.totalorder %v2079_v12, %v524_v2  ;;  %vm672_vm5 = vcmp.eq.s32.totalorder %v2079_v12, %v525_v3  ;;  %vm539_vm6 = vcmp.eq.s32.totalorder %v2069_v8, %v522_v5  ;;  %p1870_p11 = scmp.ne.s32.totalorder %s1868_s23, %s1869_s22  ;;  %p1875_p1 = scmp.lt.s32.totalorder %s1873_s26, %s1869_s22 }
  0x25   : > { %vm540_vm7 = vcmp.eq.s32.totalorder %v2069_v8, %v2064_v6  ;;  %v751_v25 = vunpack.c.l.b16 %v589_v21  ;;  %v752_v26 = vunpack.c.l.b16 %v590_v22  ;;  %v799_v27 = vunpack.c.l.b16 %v654_v23 }
  0x26   : > { %v800_v28 = vunpack.c.l.b16 %v655_v24  ;;  %v1656_v29 = vsel %vm671_vm4, 1.0, %v1917_v16  ;;  %v1657_v30 = vsel %vm672_vm5, 1.0, %v1917_v16  ;;  %v1622_v31 = vsel %vm539_vm6, 1.0, %v1917_v16  ;;  %p1871_p12 = pnand %p1870_p11, %p2040_p5  ;;  %p1876_p2 = por %p1875_p1, %p1874_p0 }
  0x27   : > { %v1623_v32 = vsel %vm540_vm7, 1.0, %v1917_v16  ;;  %v760_v33 = vpack.c.b16 %v752_v26, %v751_v25  ;;  %v719_v35 = vpack.c.bf16 %v1656_v29, %v1656_v29  ;;  %v720_v36 = vpack.c.bf16 %v1657_v30, %v1657_v30 }
  0x28   : > { %v808_v34 = vpack.c.b16 %v800_v28, %v799_v27  ;;  %v587_v37 = vpack.c.bf16 %v1622_v31, %v1622_v31  ;;  %v588_v38 = vpack.c.bf16 %v1623_v32, %v1623_v32  ;;  %vm604_vm8 = vcmp.eq.s32.totalorder %v2071_v9, %v522_v5  ;;  %p1872_p13 = pneg %p1871_p12 }
  0x29   : > { %vm605_vm9 = vcmp.eq.s32.totalorder %v2071_v9, %v2064_v6  ;;  %1020 = vmatpush.bf16.msra.mxu1 %v760_v33  ;;  %v847_v39 = vunpack.c.l.b16 %v719_v35  ;;  %v848_v40 = vunpack.c.l.b16 %v720_v36  ;;  %v1638_v41 = vsel %vm604_vm8, 1.0, %v1917_v16 }
  0x2a   : > { %1049 = vmatpush.bf16.msra.mxu2 %v808_v34  ;;  %v1639_v42 = vsel %vm605_vm9, 1.0, %v1917_v16  ;;  %v749_v43 = vunpack.c.l.b16 %v587_v37  ;;  %v750_v44 = vunpack.c.l.b16 %v588_v38  ;;  %v652_v45 = vpack.c.bf16 %v1638_v41, %v1638_v41  ;;  %p1877_p3 = pnand %p1876_p2, %p1872_p13 }
  0x2b   : > { %v653_v46 = vpack.c.bf16 %v1639_v42, %v1639_v42  ;;  %v856_v47 = vpack.c.b16 %v848_v40, %v847_v39  ;;  %vm669_vm10 = vcmp.eq.s32.totalorder %v2079_v12, %v522_v5  ;;  %vm670_vm11 = vcmp.eq.s32.totalorder %v2079_v12, %v2064_v6 }
  0x2c   : > { %vm537_vm12 = vcmp.eq.s32.totalorder %v2069_v8, %v2067_v7  ;;  %v759_v48 = vpack.c.b16 %v750_v44, %v749_v43  ;;  %v797_v49 = vunpack.c.l.b16 %v652_v45  ;;  %v1654_v51 = vsel %vm669_vm10, 1.0, %v1917_v16 }
  0x2d   : > { %v798_v50 = vunpack.c.l.b16 %v653_v46  ;;  %1078 = vmatpush.bf16.msra.mxu3 %v856_v47  ;;  %v1655_v52 = vsel %vm670_vm11, 1.0, %v1917_v16  ;;  %v717_v53 = vpack.c.bf16 %v1654_v51, %v1654_v51  ;;  %vm538_vm13 = vcmp.eq.s32.totalorder %v2069_v8, %v2074_v10 }
  0x2e   : > { %v1620_v54 = vsel %vm537_vm12, 1.0, %v1917_v16  ;;  %1021 = vmatpush.bf16.msra.mxu1 %v759_v48  ;;  %v718_v56 = vpack.c.bf16 %v1655_v52, %v1655_v52  ;;  %v1621_v57 = vsel %vm538_vm13, 1.0, %v1917_v16  ;;  %vm602_vm14 = vcmp.eq.s32.totalorder %v2071_v9, %v2067_v7 }
  0x2f   : > { %v807_v55 = vpack.c.b16 %v798_v50, %v797_v49  ;;  %v585_v58 = vpack.c.bf16 %v1620_v54, %v1620_v54  ;;  %v845_v59 = vunpack.c.l.b16 %v717_v53  ;;  %v586_v60 = vpack.c.bf16 %v1621_v57, %v1621_v57 }
  0x30   : > { %vm603_vm15 = vcmp.eq.s32.totalorder %v2071_v9, %v2074_v10  ;;  %v846_v61 = vunpack.c.l.b16 %v718_v56  ;;  %v1636_v63 = vsel %vm602_vm14, 1.0, %v1917_v16  ;;  %vm667_vm0 = vcmp.eq.s32.totalorder %v2079_v12, %v2067_v7 }
  0x31   : > { %1050 = vmatpush.bf16.msra.mxu2 %v807_v55  ;;  %v747_v62 = vunpack.c.l.b16 %v585_v58  ;;  %v1637_v0 = vsel %vm603_vm15, 1.0, %v1917_v16  ;;  %v748_v2 = vunpack.c.l.b16 %v586_v60  ;;  %v650_v3 = vpack.c.bf16 %v1636_v63, %v1636_v63 }
  0x32   : > { %v651_v4 = vpack.c.bf16 %v1637_v0, %v1637_v0  ;;  %v855_v5 = vpack.c.b16 %v846_v61, %v845_v59  ;;  %vm668_vm1 = vcmp.eq.s32.totalorder %v2079_v12, %v2074_v10  ;;  %v1652_v6 = vsel %vm667_vm0, 1.0, %v1917_v16 }
  0x33   : > { %vm535_vm2 = vcmp.eq.s32.totalorder %v2069_v8, %v2077_v11  ;;  %v758_v17 = vpack.c.b16 %v748_v2, %v747_v62  ;;  %v795_v18 = vunpack.c.l.b16 %v650_v3  ;;  %v1653_v20 = vsel %vm668_vm1, 1.0, %v1917_v16 }
  0x34   : > { %v796_v19 = vunpack.c.l.b16 %v651_v4  ;;  %1079 = vmatpush.bf16.msra.mxu3 %v855_v5  ;;  %v715_v21 = vpack.c.bf16 %v1652_v6, %v1652_v6  ;;  %v716_v22 = vpack.c.bf16 %v1653_v20, %v1653_v20  ;;  %vm536_vm3 = vcmp.eq.s32.totalorder %v2069_v8, %v2082_v13 }
  0x35   : > { %v1618_v7 = vsel %vm535_vm2, 1.0, %v1917_v16  ;;  %1022 = vmatpush.bf16.msra.mxu1 %v758_v17  ;;  %v1619_v23 = vsel %vm536_vm3, 1.0, %v1917_v16  ;;  %vm600_vm4 = vcmp.eq.s32.totalorder %v2071_v9, %v2077_v11  ;;  %vm601_vm5 = vcmp.eq.s32.totalorder %v2071_v9, %v2082_v13 }
  0x36   : > { %v806_v10 = vpack.c.b16 %v796_v19, %v795_v18  ;;  %v583_v24 = vpack.c.bf16 %v1618_v7, %v1618_v7  ;;  %v843_v25 = vunpack.c.l.b16 %v715_v21  ;;  %v844_v26 = vunpack.c.l.b16 %v716_v22  ;;  %v889_v21 = vld [vmem:[%s502_s17] sm:$0x3]  ;;  %s1515_s17 = scalar_lea.sflag [#allocation3], %s496_s29 }
  0x37   : > { %v584_v27 = vpack.c.bf16 %v1619_v23, %v1619_v23  ;;  %v1634_v29 = vsel %vm600_vm4, 1.0, %v1917_v16  ;;  %v1635_v30 = vsel %vm601_vm5, 1.0, %v1917_v16  ;;  %vm665_vm6 = vcmp.eq.s32.totalorder %v2079_v12, %v2077_v11 }
  0x38   : > { %1051 = vmatpush.bf16.msra.mxu2 %v806_v10  ;;  %v745_v28 = vunpack.c.l.b16 %v583_v24  ;;  %v854_v31 = vpack.c.b16 %v844_v26, %v843_v25  ;;  %v648_v33 = vpack.c.bf16 %v1634_v29, %v1634_v29  ;;  %v649_v34 = vpack.c.bf16 %v1635_v30, %v1635_v30 }
  0x39   : > { %v746_v32 = vunpack.c.l.b16 %v584_v27  ;;  %vm666_vm7 = vcmp.eq.s32.totalorder %v2079_v12, %v2082_v13  ;;  %v1650_v35 = vsel %vm665_vm6, 1.0, %v1917_v16  ;;  %vm533_vm8 = vcmp.eq.s32.totalorder %v2069_v8, %v2085_v14 }
  0x3a   : > { %vm534_vm9 = vcmp.eq.s32.totalorder %v2069_v8, %v2088_v15  ;;  %1080 = vmatpush.bf16.msra.mxu3 %v854_v31  ;;  %v793_v37 = vunpack.c.l.b16 %v648_v33  ;;  %v794_v38 = vunpack.c.l.b16 %v649_v34  ;;  %v1651_v11 = vsel %vm666_vm7, 1.0, %v1917_v16 }
  0x3b   : > { %v757_v36 = vpack.c.b16 %v746_v32, %v745_v28  ;;  %v713_v39 = vpack.c.bf16 %v1650_v35, %v1650_v35  ;;  %v714_v40 = vpack.c.bf16 %v1651_v11, %v1651_v11  ;;  %v1616_v41 = vsel %vm533_vm8, 1.0, %v1917_v16 }
  0x3c   : > { %v1617_v13 = vsel %vm534_vm9, 1.0, %v1917_v16  ;;  %v805_v42 = vpack.c.b16 %v794_v38, %v793_v37  ;;  %v581_v43 = vpack.c.bf16 %v1616_v41, %v1616_v41  ;;  %vm598_vm10 = vcmp.eq.s32.totalorder %v2071_v9, %v2085_v14  ;;  %v1792_v38 = vld [vmem:[%s2472_s3] sm:$0xff] }
  0x3d   : > { %1023 = vmatpush.bf16.msra.mxu1 %v757_v36  ;;  %v582_v44 = vpack.c.bf16 %v1617_v13, %v1617_v13  ;;  %v841_v45 = vunpack.c.l.b16 %v713_v39  ;;  %v842_v46 = vunpack.c.l.b16 %v714_v40  ;;  %vm599_vm11 = vcmp.eq.s32.totalorder %v2071_v9, %v2088_v15 }
  0x3e   : > { %v1632_v47 = vsel %vm598_vm10, 1.0, %v1917_v16  ;;  %1052 = vmatpush.bf16.msra.mxu2 %v805_v42  ;;  %v743_v48 = vunpack.c.l.b16 %v581_v43  ;;  %v1633_v50 = vsel %vm599_vm11, 1.0, %v1917_v16  ;;  %vm663_vm12 = vcmp.eq.s32.totalorder %v2079_v12, %v2085_v14 }
  0x3f   : > { %v744_v49 = vunpack.c.l.b16 %v582_v44  ;;  %v646_v51 = vpack.c.bf16 %v1632_v47, %v1632_v47  ;;  %v853_v52 = vpack.c.b16 %v842_v46, %v841_v45  ;;  %v647_v53 = vpack.c.bf16 %v1633_v50, %v1633_v50  ;;  %v1113_v44 = vld [vmem:[%s2473_s4 + $0x30] sm:$0xff]  ;;  %v1111_v47 = vld [vmem:[%s2473_s4 + $0x20] sm:$0xff] }
  0x40   : > { %vm664_vm13 = vcmp.eq.s32.totalorder %v2079_v12, %v2088_v15  ;;  %v1648_v56 = vsel %vm663_vm12, 1.0, %v1917_v16  ;;  %v514_v61 = vadd.s32 32, %v2054_v1  ;;  %v515_v62 = vadd.s32 40, %v2054_v1 }
  0x41   : > { %v756_v54 = vpack.c.b16 %v744_v49, %v743_v48  ;;  %v791_v55 = vunpack.c.l.b16 %v646_v51  ;;  %v1649_v57 = vsel %vm664_vm13, 1.0, %v1917_v16  ;;  %1081 = vmatpush.bf16.msra.mxu3 %v853_v52  ;;  %v792_v58 = vunpack.c.l.b16 %v647_v53 }
  0x42   : > { %v711_v59 = vpack.c.bf16 %v1648_v56, %v1648_v56  ;;  %v712_v60 = vpack.c.bf16 %v1649_v57, %v1649_v57  ;;  %vm923_vm14 = vcmask 1041408   ;;  %v512_v14 = vadd.s32 16, %v2054_v1 }
  0x43   : > { %1024 = vmatpush.bf16.msra.mxu1 %v756_v54  ;;  %v513_v15 = vadd.s32 24, %v2054_v1  ;;  %v804_v63 = vpack.c.b16 %v792_v58, %v791_v55  ;;  %vm531_vm15 = vcmp.eq.s32.totalorder %v2069_v8, %v514_v61  ;;  %vm532_vm0 = vcmp.eq.s32.totalorder %v2069_v8, %v515_v62 }
  0x44   : > { %v839_v0 = vunpack.c.l.b16 %v711_v59  ;;  %v840_v2 = vunpack.c.l.b16 %v712_v60  ;;  %v1614_v3 = vsel %vm531_vm15, 1.0, %v1917_v16  ;;  %vm596_vm1 = vcmp.eq.s32.totalorder %v2071_v9, %v514_v61 }
  0x45   : > { %vm597_vm2 = vcmp.eq.s32.totalorder %v2071_v9, %v515_v62  ;;  %1053 = vmatpush.bf16.msra.mxu2 %v804_v63  ;;  %v1615_v5 = vsel %vm532_vm0, 1.0, %v1917_v16  ;;  %v579_v6 = vpack.c.bf16 %v1614_v3, %v1614_v3  ;;  %v1630_v17 = vsel %vm596_vm1, 1.0, %v1917_v16 }
  0x46   : > { %v852_v4 = vpack.c.b16 %v840_v2, %v839_v0  ;;  %v580_v18 = vpack.c.bf16 %v1615_v5, %v1615_v5  ;;  %v1631_v19 = vsel %vm597_vm2, 1.0, %v1917_v16  ;;  %v644_v20 = vpack.c.bf16 %v1630_v17, %v1630_v17 }
  0x47   : > { %vm661_vm3 = vcmp.eq.s32.totalorder %v2079_v12, %v514_v61  ;;  %v741_v22 = vunpack.c.l.b16 %v579_v6  ;;  %v645_v7 = vpack.c.bf16 %v1631_v19, %v1631_v19  ;;  %vm662_vm4 = vcmp.eq.s32.totalorder %v2079_v12, %v515_v62 }
  0x48   : > { %1082 = vmatpush.bf16.msra.mxu3 %v852_v4  ;;  %v1646_v10 = vsel %vm661_vm3, 1.0, %v1917_v16  ;;  %v742_v23 = vunpack.c.l.b16 %v580_v18  ;;  %v789_v24 = vunpack.c.l.b16 %v644_v20  ;;  %v1647_v25 = vsel %vm662_vm4, 1.0, %v1917_v16  ;;  %v1112_v18 = vld [vmem:[%s2473_s4 + $0x28] sm:$0xff]  ;;  %v1780_v20 = vld [vmem:[%s2500_s2 + $0x4] sm:$0xf] }
  0x49   : > { %v709_v26 = vpack.c.bf16 %v1646_v10, %v1646_v10  ;;  %v790_v27 = vunpack.c.l.b16 %v645_v7  ;;  %v710_v28 = vpack.c.bf16 %v1647_v25, %v1647_v25  ;;  %v925_v29 = vsel %vm923_vm14, %v889_v21, 0  ;;  %v1782_v25 = vld [vmem:[%s2500_s2 + $0x10] sm:$0xf0] }
  0x4a   : > { %vm529_vm5 = vcmp.eq.s32.totalorder %v2069_v8, %v512_v14  ;;  %v755_v30 = vpack.c.b16 %v742_v23, %v741_v22  ;;  %934 = vmatpush.bf16.msra.mxu0 %v925_v29  ;;  %vm530_vm6 = vcmp.eq.s32.totalorder %v2069_v8, %v513_v15  ;;  %vm594_vm7 = vcmp.eq.s32.totalorder %v2071_v9, %v512_v14 }
  0x4b   : > { %v837_v31 = vunpack.c.l.b16 %v709_v26  ;;  %v1612_v32 = vsel %vm529_vm5, 1.0, %v1917_v16  ;;  %v803_v33 = vpack.c.b16 %v790_v27, %v789_v24  ;;  %v838_v34 = vunpack.c.l.b16 %v710_v28  ;;  %v1688_v24 = vld [vmem:[%s2500_s2 + $0x8] sm:$0xf] }
  0x4c   : > { %v1613_v35 = vsel %vm530_vm6, 1.0, %v1917_v16  ;;  %v577_v36 = vpack.c.bf16 %v1612_v32, %v1612_v32  ;;  %1025 = vmatpush.bf16.msra.mxu1 %v755_v30  ;;  %vm595_vm8 = vcmp.eq.s32.totalorder %v2071_v9, %v513_v15  ;;  %vm659_vm9 = vcmp.eq.s32.totalorder %v2079_v12, %v512_v14  ;;  %v1793_v28 = vld [vmem:[%s2472_s3 + $0x8] sm:$0xff]  ;;  %v1107_v30 = vld [vmem:[%s2473_s4] sm:$0xff]  ;;  %v1109_v32 = vld [vmem:[%s2473_s4 + $0x10] sm:$0xff] }
  0x4d   : > { %v578_v37 = vpack.c.bf16 %v1613_v35, %v1613_v35  ;;  %1054 = vmatpush.bf16.msra.mxu2 %v803_v33  ;;  %v851_v11 = vpack.c.b16 %v838_v34, %v837_v31  ;;  %v1628_v40 = vsel %vm594_vm7, 1.0, %v1917_v16  ;;  %v1629_v41 = vsel %vm595_vm8, 1.0, %v1917_v16  ;;  %v1108_v31 = vld [vmem:[%s2473_s4 + $0x8] sm:$0xff]  ;;  %v1692_v33 = vld [vmem:[%s2500_s2 + $0x18] sm:$0xf] }
  0x4e   : > { %v739_v39 = vunpack.c.l.b16 %v577_v36  ;;  %v642_v42 = vpack.c.bf16 %v1628_v40, %v1628_v40  ;;  %v643_v43 = vpack.c.bf16 %v1629_v41, %v1629_v41  ;;  %vm660_vm10 = vcmp.eq.s32.totalorder %v2079_v12, %v513_v15  ;;  %v1182_v34 = vld [vmem:[%s2475_s6 + $0x38] sm:$0xff]  ;;  %v1784_v35 = vld [vmem:[%s2500_s2 + $0x20] sm:$0xf0]  ;;  %v1700_v40 = vld [vmem:[%s2500_s2 + $0x20] sm:$0xf] }
  0x4f   : > { %v740_v13 = vunpack.c.l.b16 %v578_v37  ;;  %1083 = vmatpush.bf16.msra.mxu3 %v851_v11  ;;  %v1644_v45 = vsel %vm659_vm9, 1.0, %v1917_v16  ;;  %v1645_v46 = vsel %vm660_vm10, 1.0, %v1917_v16  ;;  %vm910_vm11 = vcmask 31744   ;;  %v1179_v36 = vld [vmem:[%s2475_s6 + $0x20] sm:$0xff]  ;;  %v1110_v37 = vld [vmem:[%s2473_s4 + $0x18] sm:$0xff] }
  0x50   : > { %v787_v49 = vunpack.c.l.b16 %v642_v42  ;;  %v788_v50 = vunpack.c.l.b16 %v643_v43  ;;  %v707_v51 = vpack.c.bf16 %v1644_v45, %v1644_v45  ;;  %v1918_v52 = vmov 0   ;;  %1674 = vmatmul.msk.bf16.vlgmr.msra.gmra.mxu0 %vm910_vm11, %v1792_v38  ;;  %v1783_v38 = vld [vmem:[%s2500_s2 + $0x1c] sm:$0xf]  ;;  %v1694_v11 = vld [vmem:[%s2500_s2 + $0x24] sm:$0xf0]  ;;  %v1794_v42 = vld [vmem:[%s2472_s3 + $0x10] sm:$0xff] }
  0x51   : > { %v754_v48 = vpack.c.b16 %v740_v13, %v739_v39  ;;  %1850 = vset.pattern.permute.xlu0 %v1918_v52  ;;  %v708_v53 = vpack.c.bf16 %v1645_v46, %v1645_v46  ;;  %v511_v54 = vadd.s32 8, %v2054_v1  ;;  %vm527_vm12 = vcmp.eq.s32.totalorder %v2069_v8, %v2054_v1  ;;  %1851 = vset.pattern.permute.xlu1 %v1918_v52  ;;  %v1785_v41 = vld [vmem:[%s2500_s2 + $0x28] sm:$0xf0]  ;;  %v1178_v45 = vld [vmem:[%s2475_s6 + $0x18] sm:$0xff]  ;;  %v1181_v46 = vld [vmem:[%s2475_s6 + $0x30] sm:$0xff] }
  0x52   : > { %1147 = vperm.xlu0 %1850, %v1113_v44   ;;  %vm592_vm13 = vcmp.eq.s32.totalorder %v2071_v9, %v2054_v1  ;;  %v802_v55 = vpack.c.b16 %v788_v50, %v787_v49  ;;  %v835_v56 = vunpack.c.l.b16 %v707_v51  ;;  %v1610_v57 = vsel %vm527_vm12, 1.0, %v1917_v16  ;;  %1137 = vperm.xlu1 %1851, %v1111_v47   ;;  %v1177_v44 = vld [vmem:[%s2475_s6 + $0x10] sm:$0xff]  ;;  %v1787_v49 = vld [vmem:[%s2500_s2 + $0x38] sm:$0xf0]  ;;  %v1180_v51 = vld [vmem:[%s2475_s6 + $0x28] sm:$0xff] }
  0x53   : > { %1026 = vmatpush.bf16.msra.mxu1 %v754_v48  ;;  %v1626_v58 = vsel %vm592_vm13, 1.0, %v1917_v16  ;;  %v836_v59 = vunpack.c.l.b16 %v708_v53  ;;  %vm528_vm14 = vcmp.eq.s32.totalorder %v2069_v8, %v511_v54  ;;  %v575_v60 = vpack.c.bf16 %v1610_v57, %v1610_v57  ;;  %1852 = vset.pattern.permute.xlu2 %v1918_v52  ;;  %v1704_v47 = vld [vmem:[%s2500_s2 + $0x30] sm:$0xf]  ;;  %v1176_v48 = vld [vmem:[%s2475_s6 + $0x8] sm:$0xff]  ;;  %v1786_v52 = vld [vmem:[%s2500_s2 + $0x34] sm:$0xf] }
  0x54   : > { %vm593_vm15 = vcmp.eq.s32.totalorder %v2071_v9, %v511_v54  ;;  %1055 = vmatpush.bf16.msra.mxu2 %v802_v55  ;;  %v1611_v61 = vsel %vm528_vm14, 1.0, %v1917_v16  ;;  %v640_v14 = vpack.c.bf16 %v1626_v58, %v1626_v58  ;;  %vm657_vm0 = vcmp.eq.s32.totalorder %v2079_v12, %v2054_v1  ;;  %v1114_v9 = vld [vmem:[%s2473_s4 + $0x38] sm:$0xff]  ;;  %v1680_v1 = vld [vmem:[%s2500_s2] sm:$0xf]  ;;  %1127 = vperm.xlu2 %1852, %v1109_v32   ;;  %v1303_v50 = vld [vmem:[%s2477_s8 + $0x10] sm:$0xff] }
  0x55   : > { %v1627_v62 = vsel %vm593_vm15, 1.0, %v1917_v16  ;;  %v850_v15 = vpack.c.b16 %v836_v59, %v835_v56  ;;  %v576_v63 = vpack.c.bf16 %v1611_v61, %v1611_v61  ;;  %v737_v0 = vunpack.c.l.b16 %v575_v60  ;;  %v1706_v53 = vld [vmem:[%s2500_s2 + $0x3c] sm:$0xf0]  ;;  %v1712_v55 = vld [vmem:[%s2500_s2 + $0x38] sm:$0xf]  ;;  %v1302_v61 = vld [vmem:[%s2477_s8 + $0x8] sm:$0xff] }
  0x56   : > { %v641_v2 = vpack.c.bf16 %v1627_v62, %v1627_v62  ;;  %v785_v3 = vunpack.c.l.b16 %v640_v14  ;;  %vm658_vm1 = vcmp.eq.s32.totalorder %v2079_v12, %v511_v54  ;;  %v1642_v8 = vsel %vm657_vm0, 1.0, %v1917_v16  ;;  %v1781_v12 = vld [vmem:[%s2500_s2 + $0x8] sm:$0xf0]  ;;  %v1788_v56 = vld [vmem:[%s2500_s2 + $0x40] sm:$0xf0]  ;;  %v1795_v58 = vld [vmem:[%s2472_s3 + $0x18] sm:$0xff] }
  0x57   : > { %1084 = vmatpush.bf16.msra.mxu3 %v850_v15  ;;  %v738_v4 = vunpack.c.l.b16 %v576_v63  ;;  %v1643_v6 = vsel %vm658_vm1, 1.0, %v1917_v16  ;;  %v705_v17 = vpack.c.bf16 %v1642_v8, %v1642_v8  ;;  %v1682_v16 = vld [vmem:[%s2500_s2 + $0xc] sm:$0xf0]  ;;  %v1681_v23 = vor.u32 %v1781_v12, %v1680_v1  ;;  %v1301_v60 = vld [vmem:[%s2477_s8] sm:$0xff]  ;;  %v1716_v14 = vld [vmem:[%s2500_s2 + $0x48] sm:$0xf] }
  0x58   : > { %v786_v5 = vunpack.c.l.b16 %v641_v2  ;;  %v706_v19 = vpack.c.bf16 %v1643_v6, %v1643_v6  ;;  %v1685_v26 = vor.u32 %v1780_v20, %v1682_v16  ;;  %v1689_v29 = vor.u32 %v1782_v25, %v1688_v24  ;;  %v1175_v62 = vld [vmem:[%s2475_s6] sm:$0xff]  ;;  %v1373_v15 = vld [vmem:[%s2479_s10 + $0x18] sm:$0xff]  ;;  %v1790_v63 = vld [vmem:[%s2500_s2 + $0x50] sm:$0xf0] }
  0x59   : > { %v753_v21 = vpack.c.b16 %v738_v4, %v737_v0  ;;  %v833_v7 = vunpack.c.l.b16 %v705_v17  ;;  %v1693_v39 = vor.u32 %v1784_v35, %v1692_v33  ;;  %v1697_v13 = vor.u32 %v1783_v38, %v1694_v11  ;;  %v1370_v0 = vld [vmem:[%s2479_s10] sm:$0xff]  ;;  %v1304_v2 = vld [vmem:[%s2477_s8 + $0x18] sm:$0xff]  ;;  %v1724_v4 = vld [vmem:[%s2500_s2 + $0x50] sm:$0xf] }
  0x5a   : > { %v801_v22 = vpack.c.b16 %v786_v5, %v785_v3  ;;  %1152 = vperm.xlu0 %1850, %v1114_v9   ;;  %v834_v10 = vunpack.c.l.b16 %v706_v19  ;;  %1142 = vperm.xlu1 %1851, %v1112_v18   ;;  %v1701_v43 = vor.u32 %v1785_v41, %v1700_v40  ;;  %v1705_v54 = vor.u32 %v1787_v49, %v1704_v47  ;;  %v1789_v3 = vld [vmem:[%s2500_s2 + $0x4c] sm:$0xf]  ;;  %v1718_v8 = vld [vmem:[%s2500_s2 + $0x54] sm:$0xf0]  ;;  %v1791_v5 = vld [vmem:[%s2500_s2 + $0x58] sm:$0xf0] }
  0x5b   : > { %1027 = vmatpush.bf16.msra.mxu1 %v753_v21  ;;  %v1709_v57 = vor.u32 %v1786_v52, %v1706_v53  ;;  %v1713_v59 = vor.u32 %v1788_v56, %v1712_v55  ;;  %v1717_v9 = vor.u32 %v1790_v63, %v1716_v14  ;;  %v1721_v6 = vor.u32 %v1789_v3, %v1718_v8  ;;  %v1438_v1 = vld [vmem:[%s2481_s12] sm:$0xff]  ;;  %v1439_v12 = vld [vmem:[%s2481_s12 + $0x8] sm:$0xff]  ;;  %v1372_v18 = vld [vmem:[%s2479_s10 + $0x10] sm:$0xff] }
  0x5c   : > { %1056 = vmatpush.bf16.msra.mxu2 %v801_v22  ;;  %v849_v27 = vpack.c.b16 %v834_v10, %v833_v7  ;;  %1132 = vperm.xlu2 %1852, %v1110_v37   ;;  %v1725_v17 = vor.u32 %v1791_v5, %v1724_v4  ;;  %v1478_v19 = vld [vmem:[%s2483_s14 + $0x8] sm:$0x3]  ;;  %v1477_v16 = vld [vmem:[%s2483_s14] sm:$0xff]  ;;  %vm1243_vm2 = vcmask 523264   ;;  %vm1404_vm3 = vcmask 261120  }
  0x5d   : > { %v1371_v20 = vld [vmem:[%s2479_s10 + $0x8] sm:$0xff]  ;;  %vm1494_vm4 = vcmask 130048  }
  0x5e   : > { %1085 = vmatpush.bf16.msra.mxu3 %v849_v27  ;;  %1028 = vmatmul.bf16.vlgmr.msra.gmra.mxu1 %v1681_v23 }
  0x5f   : > { %1057 = vmatmul.bf16.vlgmr.msra.gmra.mxu2 %v1685_v26 }
  0x60   : > { %1675 = vmatmul.msk.bf16.gmra.mxu0 %vm910_vm11, %v1793_v28 }
  0x61   : > { %1086 = vmatmul.bf16.vlgmr.msra.gmra.mxu3 %v1689_v29 }
  0x62   : > { %1117 = vperm.xlu0 %1850, %v1107_v30   ;;  %1122 = vperm.xlu1 %1851, %v1108_v31  }
  0x64   : > { %1215 = vperm.xlu2 %1852, %v1181_v46  }
  0x6a   : > { %1220 = vperm.xlu0 %1850, %v1182_v34   ;;  %1205 = vperm.xlu1 %1851, %v1179_v36  }
  0x6c   : > { %1210 = vperm.xlu2 %1852, %v1180_v51  }
  0x6e   : > { %1033 = vmatmul.bf16.gmra.mxu1 %v1693_v39 }
  0x6f   : > { %1062 = vmatmul.bf16.gmra.mxu2 %v1697_v13 }
  0x70   : > { %1676 = vmatmul.msk.bf16.gmra.mxu0 %vm910_vm11, %v1794_v42 }
  0x71   : > { %1091 = vmatmul.bf16.gmra.mxu3 %v1701_v43 }
  0x72   : > { %1195 = vperm.xlu0 %1850, %v1177_v44   ;;  %1200 = vperm.xlu1 %1851, %v1178_v45  }
  0x74   : > { %1185 = vperm.xlu2 %1852, %v1175_v62  }
  0x7a   : > { %1190 = vperm.xlu0 %1850, %v1176_v48   ;;  %1317 = vperm.xlu1 %1851, %v1303_v50  }
  0x7c   : > { %1322 = vperm.xlu2 %1852, %v1304_v2  }
  0x7e   : > { %1038 = vmatmul.bf16.gmra.mxu1 %v1705_v54 }
  0x7f   : > { %1067 = vmatmul.bf16.gmra.mxu2 %v1709_v57 }
  0x80   : > { %1677 = vmatmul.msk.bf16.gmra.mxu0 %vm910_vm11, %v1795_v58 }
  0x81   : > { %1096 = vmatmul.bf16.gmra.mxu3 %v1713_v59 }
  0x82   : > { %1307 = vperm.xlu0 %1850, %v1301_v60   ;;  %1312 = vperm.xlu1 %1851, %v1302_v61  }
  0x84   : > { %1386 = vperm.xlu2 %1852, %v1372_v18  }
  0x8a   : > { %1391 = vperm.xlu0 %1850, %v1373_v15   ;;  %1376 = vperm.xlu1 %1851, %v1370_v0  }
  0x8c   : > { %1381 = vperm.xlu2 %1852, %v1371_v20  }
  0x8e   : > { %1043 = vmatmul.bf16.gmra.mxu1 %v1717_v9 }
  0x8f   : > { %1072 = vmatmul.bf16.gmra.mxu2 %v1721_v6 }
  0x91   : > { %1101 = vmatmul.bf16.gmra.mxu3 %v1725_v17 }
  0x92   : > { %1442 = vperm.xlu0 %1850, %v1438_v1   ;;  %1447 = vperm.xlu1 %1851, %v1439_v12  }
  0x94   : > { %1481 = vperm.xlu2 %1852, %v1477_v16  }
  0x9a   : > { %1486 = vperm.xlu0 %1850, %v1478_v19  }
  0xae   : > { %v1128_v58 = vpop.permute.xlu2 %1127 }
  0xc4   : > { %v1148_v47 = vpop.permute.xlu0 %1147  ;;  %v1138_v49 = vpop.permute.xlu1 %1137 }
  0xcc   : > { %v1153_v8 = vpop.permute.xlu0 %1152  ;;  %v1143_v9 = vpop.permute.xlu1 %1142 }
  0xcd   : > { %v936_v21 = vpop.f32.mrf.mxu0 }
  0xd5   : > { %v938_v10 = vpop.f32.mrf.mxu0 }
  0xdb   : > { %v1029_v22 = vpop.f32.mrf.mxu1 }
  0xdc   : > { %v1030_v7 = vadd.f32 %v1029_v22, %v936_v21  ;;  %v1133_v22 = vpop.permute.xlu2 %1132 }
  0xdd   : > { %v941_v28 = vpop.f32.mrf.mxu0 }
  0xe2   : > { %v1058_v23 = vpop.f32.mrf.mxu2 }
  0xe3   : > { %v1059_v24 = vadd.f32 %v1058_v23, %v1030_v7  ;;  %v1031_v25 = vpop.f32.mrf.mxu1 }
  0xe4   : > { %v1087_v26 = vpop.f32.mrf.mxu3  ;;  %v1032_v4 = vadd.f32 %v1031_v25, %v938_v10  ;;  %v1118_v25 = vpop.permute.xlu0 %1117 }
  0xe5   : > { %v2392_v27 = vadd.f32 %v1087_v26, %v1059_v24  ;;  %v943_v32 = vpop.f32.mrf.mxu0 }
  0xea   : > { %v1060_v29 = vpop.f32.mrf.mxu2 }
  0xeb   : > { %v1034_v30 = vpop.f32.mrf.mxu1  ;;  %v1061_v12 = vadd.f32 %v1060_v29, %v1032_v4 }
  0xec   : > { %v1089_v31 = vpop.f32.mrf.mxu3  ;;  %v1035_v59 = vadd.f32 %v1034_v30, %v941_v28  ;;  %v1123_v28 = vpop.permute.xlu1 %1122 }
  0xed   : > { %v946_v36 = vpop.f32.mrf.mxu0  ;;  %v1090_v7 = vadd.f32 %v1089_v31, %v1061_v12  ;;  %v1797_v31 = vld [vmem:[%s2474_s5 + $0x8] sm:$0xff] }
  0xef   : > { %v1156_v30 = vadd.f32 %v1123_v28, %v1090_v7 }
  0xf2   : > { %v1063_v33 = vpop.f32.mrf.mxu2 }
  0xf3   : > { %v1036_v34 = vpop.f32.mrf.mxu1  ;;  %v1064_v5 = vadd.f32 %v1063_v33, %v1035_v59  ;;  %v1796_v33 = vld [vmem:[%s2474_s5] sm:$0xff] }
  0xf4   : > { %v1092_v35 = vpop.f32.mrf.mxu3  ;;  %v1037_v61 = vadd.f32 %v1036_v34, %v943_v32  ;;  %v1155_v32 = vadd.f32 %v1118_v25, %v2392_v27  ;;  %v1798_v27 = vld [vmem:[%s2474_s5 + $0x10] sm:$0xff]  ;;  %v1799_v34 = vld [vmem:[%s2474_s5 + $0x18] sm:$0xff]  ;;  %v1803_v25 = vld [vmem:[%s2478_s9 + $0x8] sm:$0xff] }
  0xf5   : > { %v948_v41 = vpop.f32.mrf.mxu0  ;;  %v1093_v16 = vadd.f32 %v1092_v35, %v1064_v5 }
  0xf6   : > { %v1163_v29 = vpack.c.bf16 %v1156_v30, %v1155_v32 }
  0xf7   : > { %v1157_v26 = vadd.f32 %v1128_v58, %v1093_v16 }
  0xfa   : > { %v1065_v37 = vpop.f32.mrf.mxu2 }
  0xfb   : > { %v1039_v38 = vpop.f32.mrf.mxu1  ;;  %v1066_v0 = vadd.f32 %v1065_v37, %v1037_v61 }
  0xfc   : > { %v1094_v11 = vpop.f32.mrf.mxu3  ;;  %v1040_v52 = vadd.f32 %v1039_v38, %v946_v36 }
  0xfd   : > { %v951_v45 = vpop.f32.mrf.mxu0  ;;  %v1095_v18 = vadd.f32 %v1094_v11, %v1066_v0 }
  0xff   : > { %v1158_v23 = vadd.f32 %v1133_v22, %v1095_v18 }
 0x101   : > { %v1164_v10 = vpack.c.bf16 %v1158_v23, %v1157_v26 }
 0x102   : > { %v1068_v39 = vpop.f32.mrf.mxu2 }
 0x103   : > { %v1041_v40 = vpop.f32.mrf.mxu1  ;;  %v1069_v62 = vadd.f32 %v1068_v39, %v1040_v52 }
 0x104   : > { %v1097_v13 = vpop.f32.mrf.mxu3  ;;  %v1042_v53 = vadd.f32 %v1041_v40, %v948_v41  ;;  %v1221_v40 = vpop.permute.xlu0 %1220 }
 0x105   : > { %v953_v55 = vpop.f32.mrf.mxu0  ;;  %v1098_v6 = vadd.f32 %v1097_v13, %v1069_v62  ;;  %v1216_v41 = vpop.permute.xlu2 %1215 }
 0x107   : > { %v1159_v21 = vadd.f32 %v1138_v49, %v1098_v6 }
 0x10a   : > { %v1070_v42 = vpop.f32.mrf.mxu2 }
 0x10b   : > { %v1044_v44 = vpop.f32.mrf.mxu1  ;;  %v1071_v56 = vadd.f32 %v1070_v42, %v1042_v53  ;;  %v1206_v42 = vpop.permute.xlu1 %1205 }
 0x10c   : > { %v1099_v43 = vpop.f32.mrf.mxu3  ;;  %v1045_v48 = vadd.f32 %v1044_v44, %v951_v45 }
 0x10d   : > { %v1100_v2 = vadd.f32 %v1099_v43, %v1071_v56  ;;  %v1196_v43 = vpop.permute.xlu0 %1195  ;;  %v1211_v45 = vpop.permute.xlu2 %1210 }
 0x10f   : > { %v1160_v19 = vadd.f32 %v1143_v9, %v1100_v2  ;;  %v1801_v9 = vld [vmem:[%s2476_s7 + $0x8] sm:$0xff] }
 0x111   : > { %v1165_v24 = vpack.c.bf16 %v1160_v19, %v1159_v21 }
 0x112   : > { %v1073_v46 = vpop.f32.mrf.mxu2 }
 0x113   : > { %v1046_v51 = vpop.f32.mrf.mxu1  ;;  %v1074_v54 = vadd.f32 %v1073_v46, %v1045_v48  ;;  %v1201_v52 = vpop.permute.xlu1 %1200 }
 0x114   : > { %v1102_v50 = vpop.f32.mrf.mxu3  ;;  %v1047_v57 = vadd.f32 %v1046_v51, %v953_v55 }
 0x115   : > { %v1103_v14 = vadd.f32 %v1102_v50, %v1074_v54  ;;  %v1191_v58 = vpop.permute.xlu0 %1190  ;;  %v1186_v62 = vpop.permute.xlu2 %1185 }
 0x117   : > { %v1161_v17 = vadd.f32 %v1148_v47, %v1103_v14 }
 0x11a   : > { %v1075_v60 = vpop.f32.mrf.mxu2 }
 0x11b   : > { %v1076_v15 = vadd.f32 %v1075_v60, %v1047_v57  ;;  %v1318_v6 = vpop.permute.xlu1 %1317 }
 0x11c   : > { %v1104_v63 = vpop.f32.mrf.mxu3 }
 0x11d   : > { %v1105_v3 = vadd.f32 %v1104_v63, %v1076_v15  ;;  %v1308_v21 = vpop.permute.xlu0 %1307 }
 0x11f   : > { %v1162_v1 = vadd.f32 %v1153_v8, %v1105_v3  ;;  %v1800_v8 = vld [vmem:[%s2476_s7] sm:$0xff] }
 0x121   : > { %v1166_v20 = vpack.c.bf16 %v1162_v1, %v1161_v17  ;;  %v1323_v1 = vpop.permute.xlu2 %1322 }
 0x123   : > { %1260 = vmatpush.bf16.msrb.mxu0 %v1166_v20  ;;  %v1313_v18 = vpop.permute.xlu1 %1312 }
 0x127   : > { %1261 = vmatpush.bf16.msrb.mxu0 %v1165_v24 }
 0x12b   : > { %1262 = vmatpush.bf16.msrb.mxu0 %v1164_v10  ;;  %v1802_v10 = vld [vmem:[%s2478_s9] sm:$0xff] }
 0x12f   : > { %1263 = vmatpush.bf16.msrb.mxu0 %v1163_v29 }
 0x132   : > { %1742 = vmatmul.msk.bf16.vlgmr.msrb.gmra.mxu0 %vm1243_vm2, %v1796_v33  ;;  %v1387_v33 = vpop.permute.xlu2 %1386 }
 0x142   : > { %1743 = vmatmul.msk.bf16.gmra.mxu0 %vm1243_vm2, %v1797_v31 }
 0x152   : > { %1744 = vmatmul.msk.bf16.gmra.mxu0 %vm1243_vm2, %v1798_v27  ;;  %v1382_v27 = vpop.permute.xlu2 %1381 }
 0x162   : > { %1745 = vmatmul.msk.bf16.gmra.mxu0 %vm1243_vm2, %v1799_v34 }
 0x1af   : > { %v1265_v35 = vpop.f32.mrf.mxu0 }
 0x1b0   : > { %v1266_v14 = vadd.f32 %v1265_v35, %v1186_v62  ;;  %v1392_v35 = vpop.permute.xlu0 %1391 }
 0x1b2   : > { %v1285_v2 = vmax.f32 %v1266_v14, 0.0 }
 0x1b7   : > { %v1267_v36 = vpop.f32.mrf.mxu0 }
 0x1b8   : > { %v1268_v59 = vadd.f32 %v1267_v36, %v1191_v58  ;;  %v1482_v58 = vpop.permute.xlu2 %1481 }
 0x1ba   : > { %v1286_v63 = vmax.f32 %v1268_v59, 0.0 }
 0x1bc   : > { %v1293_v3 = vpack.c.bf16 %v1286_v63, %v1285_v2 }
 0x1bf   : > { %v1270_v37 = vpop.f32.mrf.mxu0 }
 0x1c0   : > { %v1271_v56 = vadd.f32 %v1270_v37, %v1196_v43 }
 0x1c2   : > { %v1287_v15 = vmax.f32 %v1271_v56, 0.0 }
 0x1c7   : > { %v1272_v38 = vpop.f32.mrf.mxu0 }
 0x1c8   : > { %v1273_v53 = vadd.f32 %v1272_v38, %v1201_v52 }
 0x1ca   : > { %v1288_v60 = vmax.f32 %v1273_v53, 0.0 }
 0x1cc   : > { %v1294_v0 = vpack.c.bf16 %v1288_v60, %v1287_v15 }
 0x1cf   : > { %v1275_v11 = vpop.f32.mrf.mxu0 }
 0x1d0   : > { %v1276_v49 = vadd.f32 %v1275_v11, %v1206_v42  ;;  %v1377_v11 = vpop.permute.xlu1 %1376 }
 0x1d2   : > { %v1289_v57 = vmax.f32 %v1276_v49, 0.0 }
 0x1d7   : > { %v1277_v39 = vpop.f32.mrf.mxu0 }
 0x1d8   : > { %v1278_v47 = vadd.f32 %v1277_v39, %v1211_v45  ;;  %v1804_v45 = vld [vmem:[%s2480_s11] sm:$0xff]  ;;  %v1448_v49 = vpop.permute.xlu1 %1447 }
 0x1da   : > { %v1290_v54 = vmax.f32 %v1278_v47, 0.0  ;;  %v1443_v47 = vpop.permute.xlu0 %1442 }
 0x1dc   : > { %v1295_v61 = vpack.c.bf16 %v1290_v54, %v1289_v57  ;;  %v1773_v54 = vld [vmem:[%s2482_s13] sm:$0xf] }
 0x1df   : > { %v1280_v13 = vpop.f32.mrf.mxu0 }
 0x1e0   : > { %v1281_v44 = vadd.f32 %v1280_v13, %v1216_v41 }
 0x1e2   : > { %v1291_v50 = vmax.f32 %v1281_v44, 0.0 }
 0x1e7   : > { %v1282_v46 = vpop.f32.mrf.mxu0 }
 0x1e8   : > { %v1283_v48 = vadd.f32 %v1282_v46, %v1221_v40 }
 0x1ea   : > { %v1292_v51 = vmax.f32 %v1283_v48, 0.0 }
 0x1ec   : > { %v1296_v55 = vpack.c.bf16 %v1292_v51, %v1291_v50 }
 0x1ee   : > { %1345 = vmatpush.bf16.msrb.mxu1 %v1296_v55  ;;  %v1805_v55 = vld [vmem:[%s2482_s13] sm:$0x10] }
 0x1ef   : > { %v1774_v57 = vor.u32 %v1805_v55, %v1773_v54 }
 0x1f2   : > { %1346 = vmatpush.bf16.msrb.mxu1 %v1295_v61  ;;  %v1487_v61 = vpop.permute.xlu0 %1486 }
 0x1f6   : > { %1347 = vmatpush.bf16.msrb.mxu1 %v1294_v0 }
 0x1fa   : > { %1348 = vmatpush.bf16.msrb.mxu1 %v1293_v3 }
 0x1fd   : > { %1754 = vmatmul.msk.bf16.vlgmr.msrb.gmra.mxu1 %vm1243_vm2, %v1800_v8 }
 0x20d   : > { %1755 = vmatmul.msk.bf16.gmra.mxu1 %vm1243_vm2, %v1801_v9 }
 0x27a   : > { %v1350_v4 = vpop.f32.mrf.mxu1 }
 0x27b   : > { %v1351_v22 = vadd.f32 %v1350_v4, %v1308_v21 }
 0x27d   : > { %v1360_v28 = vmax.f32 %v1351_v22, 0.0 }
 0x282   : > { %v1352_v5 = vpop.f32.mrf.mxu1 }
 0x283   : > { %v1353_v20 = vadd.f32 %v1352_v5, %v1313_v18 }
 0x285   : > { %v1361_v24 = vmax.f32 %v1353_v20, 0.0 }
 0x287   : > { %v1364_v30 = vpack.c.bf16 %v1361_v24, %v1360_v28 }
 0x28a   : > { %v1355_v17 = vpop.f32.mrf.mxu1 }
 0x28b   : > { %v1356_v12 = vadd.f32 %v1355_v17, %v1318_v6 }
 0x28d   : > { %v1362_v7 = vmax.f32 %v1356_v12, 0.0 }
 0x292   : > { %v1357_v19 = vpop.f32.mrf.mxu1 }
 0x293   : > { %v1358_v16 = vadd.f32 %v1357_v19, %v1323_v1 }
 0x295   : > { %v1363_v23 = vmax.f32 %v1358_v16, 0.0 }
 0x297   : > { %v1365_v26 = vpack.c.bf16 %v1363_v23, %v1362_v7 }
 0x299   : > { %1417 = vmatpush.bf16.msrb.mxu2 %v1365_v26 }
 0x29d   : > { %1418 = vmatpush.bf16.msrb.mxu2 %v1364_v30 }
 0x2a0   : > { %1764 = vmatmul.msk.bf16.vlgmr.msrb.gmra.mxu2 %vm1404_vm3, %v1802_v10 }
 0x2b0   : > { %1765 = vmatmul.msk.bf16.gmra.mxu2 %vm1404_vm3, %v1803_v25 }
 0x323   : > { %v1420_v32 = vpop.f32.mrf.mxu2 }
 0x324   : > { %v1421_v39 = vadd.f32 %v1420_v32, %v1377_v11 }
 0x326   : > { %v1430_v43 = vmax.f32 %v1421_v39, 0.0 }
 0x32b   : > { %v1422_v29 = vpop.f32.mrf.mxu2 }
 0x32c   : > { %v1423_v37 = vadd.f32 %v1422_v29, %v1382_v27 }
 0x32e   : > { %v1431_v13 = vmax.f32 %v1423_v37, 0.0 }
 0x330   : > { %v1434_v44 = vpack.c.bf16 %v1431_v13, %v1430_v43 }
 0x333   : > { %v1425_v31 = vpop.f32.mrf.mxu2 }
 0x334   : > { %v1426_v34 = vadd.f32 %v1425_v31, %v1387_v33 }
 0x336   : > { %v1432_v40 = vmax.f32 %v1426_v34, 0.0 }
 0x33b   : > { %v1427_v36 = vpop.f32.mrf.mxu2 }
 0x33c   : > { %v1428_v38 = vadd.f32 %v1427_v36, %v1392_v35 }
 0x33e   : > { %v1433_v41 = vmax.f32 %v1428_v38, 0.0 }
 0x340   : > { %v1435_v42 = vpack.c.bf16 %v1433_v41, %v1432_v40 }
 0x342   : > { %1464 = vmatpush.bf16.msrb.mxu3 %v1435_v42 }
 0x346   : > { %1465 = vmatpush.bf16.msrb.mxu3 %v1434_v44 }
 0x349   : > { %1770 = vmatmul.msk.bf16.vlgmr.msrb.gmra.mxu3 %vm1404_vm3, %v1804_v45 }
 0x3cc   : > { %v1467_v46 = vpop.f32.mrf.mxu3 }
 0x3cd   : > { %v1468_v48 = vadd.f32 %v1467_v46, %v1443_v47 }
 0x3cf   : > { %v1472_v52 = vmax.f32 %v1468_v48, 0.0 }
 0x3d4   : > { %v1469_v50 = vpop.f32.mrf.mxu3 }
 0x3d5   : > { %v1470_v51 = vadd.f32 %v1469_v50, %v1448_v49 }
 0x3d7   : > { %v1473_v53 = vmax.f32 %v1470_v51, 0.0 }
 0x3d9   : > { %v1474_v56 = vpack.c.bf16 %v1473_v53, %v1472_v52 }
 0x3db   : > { %1505 = vmatpush.bf16.msra.mxu3 %v1474_v56 }
 0x3de   : > { %1775 = vmatmul.msk.bf16.vlgmr.msra.gmra.mxu3 %vm1494_vm4, %v1774_v57 }
 0x461   : > { %v1507_v59 = vpop.f32.mrf.mxu3 }
 0x462   : > { %v1508_v60 = vadd.f32 %v1507_v59, %v1482_v58 }
 0x464   : > { %1512 = vst [vmem:[%s498_s30] sm:$0xff] %v1508_v60 }
 0x469   : > { %v1509_v62 = vpop.f32.mrf.mxu3 }
 0x46a   : > { %v1510_v14 = vadd.f32 %v1509_v62, %v1487_v61 }
 0x46c   : > { %1513 = vst [vmem:[%s498_s30 + $0x8] sm:$0x3] %v1510_v14 }
 0x46d   : > { %1880 = shalt.err (!%p1877_p3)
}
 0x46e   : > { %s1919_s29 = smov 128   ;;  %s1920_s30 = smov 256  }
 0x46f   : > { %s1921_s20 = smov 8  }
 0x470   : > { %1806 = dma.vmem_to_hbm [thread:$0]  (%p2040_p5), %s1527_s27, 256, %s1529_s16, %s1515_s17, %s1919_s29, %s1920_s30, %s1921_s20  }
 0x471 PF: > { %p1812_p4 = scmp.ge.s32.totalorder %s1915_s21, 2  ;;  %s1543_s24 = sand.u32 1, %s1903_s18  }
 0x472   : > { %s1544_s23 = scalar_lea.sflag [#allocation3], %s1543_s24 }
 0x473   : > { %p1809_p7 = pnand %p1812_p4, %p2044_p6 }
 0x475   : > { %p1810_p8 = pneg %p1809_p7 }
 0x477   : > { %1898 = dma.done.wait (%p1810_p8), %s1544_s23, 256  }
 0x478   : > { %1900 = vsyncadd (%p1810_p8), %s1544_s23, 4294967040  ;;  %s2502_s21 = sld [smem:[#allocation6_spill]]  ;;  %s2505_s18 = smov %s1907_s19 }
 0x479   : > { %s2503_s22 = sld [smem:[#allocation5_spill]] }
 0x47a   : > { %s2504_s20 = sld [smem:[#allocation7_spill]] }
 0x47e   : > { %p25_p9 = scmp.ge.s32.totalorder %s2502_s21, 4  }
 0x47f   : > { %s2506_s19 = smov %s2503_s22 }
 0x480   :  { %27 = sbr.rel (!%p25_p9) target bundleno = 7 (0x7), region = 118 }
 0x485   :  { %1550 = vsyncpa [#allocation3], 1 }
 0x486   :  { %1552 = vsyncpa [#allocation3 + $0x1], 1 }

</bundles_post_ra>
